<compile_context>
chip_gen: v6e
topology: v6e:2x2x1
jax: 0.10.0
libtpu: 0.0.40
codegen_flags: <defaults>
</compile_context>

<pallas_src>
import jax
import jax.numpy as jnp
from jax.experimental import pallas as pl
from jax.experimental.pallas import tpu as pltpu

LN_EPS = 1e-6


def _round_up(x, m):
    return ((x + m - 1) // m) * m


def output_kernel(x_ref, w_ref, b_ref, res_ref, g_ref, beta_ref, o_ref, acc_ref):
    k = pl.program_id(1)

    @pl.when(k == 0)
    def _():
        acc_ref[...] = jnp.zeros_like(acc_ref)

    # Dense: x @ W^T with W in native [H_out, H_in] layout (contract dim 1 of
    # both operands).  Activations arrive in f32 and are cast to bf16 in VMEM
    # right before the MXU; accumulation is f32.
    # NOTE: if lowered MLIR ever shows a per-step XLU transpose of the weight
    # tile at large H, pre-transpose W once in the wrapper instead.
    acc_ref[...] += jax.lax.dot_general(
        x_ref[...].astype(jnp.bfloat16), w_ref[...],
        dimension_numbers=(((1,), (1,)), ((), ())),
        preferred_element_type=jnp.float32)

    @pl.when(k == pl.num_programs(1) - 1)
    def _():
        y = acc_ref[...] + b_ref[...].astype(jnp.float32)

        # TODO(synk): Dropout(p=0.1) omitted -- inference-mode identity; a
        # training-mode kernel would use pltpu.prng_seed/prng_random_bits.

        # Residual add (f32)
        y = y + res_ref[...].astype(jnp.float32)

        # LayerNorm over the hidden (last) axis, eps=1e-6 (two-pass variance
        # form for better accuracy than E[y^2]-E[y]^2).
        h = y.shape[-1]
        mean = jnp.sum(y, axis=-1, keepdims=True) * (1.0 / h)
        centered = y - mean
        var = jnp.sum(centered * centered, axis=-1, keepdims=True) * (1.0 / h)
        inv_std = jax.lax.rsqrt(var + LN_EPS)
        o_ref[...] = (centered * inv_std * g_ref[...].astype(jnp.float32)
                      + beta_ref[...].astype(jnp.float32)).astype(o_ref.dtype)


def _vmem_need_bytes(rt, tk, h, out_itemsize):
    x_t = rt * tk * 4            # activations kept f32 in HBM (cast in-kernel)
    res_t = rt * h * 4
    out_t = rt * h * out_itemsize
    w_t = h * tk * 2             # weight is bf16
    params = 3 * h * 4
    acc = rt * h * 4
    return 2 * (x_t + res_t + out_t + w_t + params) + acc


def output_forward(hidden_states, input_tensor, weight, bias, gamma, beta,
                   *, row_tile=1024, out_dtype=None):
    """hidden_states, input_tensor: [B, S, H]; weight: [H, H] (PyTorch [out, in])."""
    B, S, H = hidden_states.shape
    M = B * S
    out_dtype = hidden_states.dtype if out_dtype is None else jnp.dtype(out_dtype)

    # K (H_in) tiling: single block for moderate H; tile for very large H so the
    # (H_out, tk) weight block stays bounded on v7x's 64 MiB VMEM.  tk must
    # divide H evenly (a partial K block would feed garbage into the reduction).
    if H <= 2048 or H % 512 != 0:
        tk = H
    else:
        tk = 512
    k_steps = H // tk

    # Row tile: as large as practical, but >= 2 steps on the parallel row axis.
    rt = min(_round_up(row_tile, 8), max(8, _round_up(pl.cdiv(M, 2), 8)))
    vmem_ceiling = 48 * 1024 * 1024    # safe on v7x's 64 MiB physical VMEM/core
    while rt > 8 and _vmem_need_bytes(rt, tk, H, out_dtype.itemsize) > vmem_ceiling - (4 << 20):
        rt = max(8, _round_up(rt // 2, 8))

    # No padding and no wrapper-side dtype casts of the activations/residual
    # (each of those would be a full extra HBM pass on a memory-bound kernel).
    x2d = hidden_states.reshape(M, H)
    res2d = input_tensor.reshape(M, H)
    w = weight.astype(jnp.bfloat16)          # native [H_out, H_in]; no transpose copy
    b2d = bias.reshape(1, H)
    g2d = gamma.reshape(1, H)
    beta2d = beta.reshape(1, H)

    grid = (pl.cdiv(M, rt), k_steps)

    need = _vmem_need_bytes(rt, tk, H, out_dtype.itemsize)
    vmem_limit = int(min(max(2 * need, 32 * 1024 * 1024), vmem_ceiling))

    out2d = pl.pallas_call(
        output_kernel,
        out_shape=jax.ShapeDtypeStruct((M, H), out_dtype),
        grid_spec=pltpu.PrefetchScalarGridSpec(
            num_scalar_prefetch=0,
            grid=grid,
            in_specs=[
                pl.BlockSpec((rt, tk), lambda i, k: (i, k)),   # activation rows (orig dtype)
                pl.BlockSpec((H, tk), lambda i, k: (0, k)),    # weight [H_out, H_in] K-slice
                pl.BlockSpec((1, H), lambda i, k: (0, 0)),     # bias
                pl.BlockSpec((rt, H), lambda i, k: (i, 0)),    # residual rows
                pl.BlockSpec((1, H), lambda i, k: (0, 0)),     # LN gamma
                pl.BlockSpec((1, H), lambda i, k: (0, 0)),     # LN beta
            ],
            out_specs=pl.BlockSpec((rt, H), lambda i, k: (i, 0)),
            scratch_shapes=[pltpu.VMEM((rt, H), jnp.float32)],
        ),
        compiler_params=pltpu.CompilerParams(
            dimension_semantics=("parallel", "arbitrary"),
            vmem_limit_bytes=vmem_limit),
    )(x2d, w, b2d, res2d, g2d, beta2d)

    return out2d.reshape(B, S, H)


def reference_forward(hidden_states, input_tensor, weight, bias, gamma, beta):
    y = jnp.einsum("bsh,oh->bso", hidden_states, weight) + bias
    y = y + input_tensor
    mean = jnp.mean(y, axis=-1, keepdims=True)
    var = jnp.mean((y - mean) ** 2, axis=-1, keepdims=True)
    return (y - mean) * jax.lax.rsqrt(var + LN_EPS) * gamma + beta


if __name__ == "__main__":
    H = 128  # att_dim

    key = jax.random.PRNGKey(0)
    k_x, k_res, k_w, k_b = jax.random.split(key, 4)

    # PyTorch Linear shapes: weight [out, in], bias [out]; LayerNorm default init.
    bound = 1.0 / (H ** 0.5)
    weight = jax.random.uniform(k_w, (H, H), minval=-bound, maxval=bound,
                                dtype=jnp.float32)
    bias = jax.random.uniform(k_b, (H,), minval=-bound, maxval=bound,
                              dtype=jnp.float32)
    gamma = jnp.ones((H,), dtype=jnp.float32)
    beta = jnp.zeros((H,), dtype=jnp.float32)

    ok = True
    # (B, S) cases: evenly tiled, and one that exercises the partial-last-block path.
    for (B, S) in [(2, 8), (3, 5)]:
        kx, kr = jax.random.split(jax.random.fold_in(k_x, B * 100 + S), 2)
        hidden_states = jax.random.normal(kx, (B, S, H), dtype=jnp.float32)
        input_tensor = jax.random.normal(kr, (B, S, H), dtype=jnp.float32)

        out = output_forward(hidden_states, input_tensor,
                             weight, bias, gamma, beta)
        out = jax.block_until_ready(out)

        ref = reference_forward(hidden_states, input_tensor,
                                weight, bias, gamma, beta)
        assert out.shape == (B, S, H)
        # bf16 matmul operands with f32 accumulation -> looser tolerance vs f32 ref
        if not jnp.allclose(out, ref, atol=2e-2, rtol=2e-2):
            ok = False

    assert ok, "mismatch vs reference"
    print("KERNEL_OK")
</pallas_src>

<mosaic_0001>
module attributes {stable_mosaic.version = 11 : i64} {
  func.func @output_kernel(%arg0: i32, %arg1: i32, %arg2: memref<8x128xf32, #tpu.memory_space<vmem>>, %arg3: memref<128x128xbf16, #tpu.memory_space<vmem>>, %arg4: memref<1x128xf32, #tpu.memory_space<vmem>>, %arg5: memref<8x128xf32, #tpu.memory_space<vmem>>, %arg6: memref<1x128xf32, #tpu.memory_space<vmem>>, %arg7: memref<1x128xf32, #tpu.memory_space<vmem>>, %arg8: memref<8x128xf32, #tpu.memory_space<vmem>>, %arg9: memref<8x128xf32, #tpu.memory_space<vmem>>) attributes {dimension_semantics = [#tpu.dimension_semantics<parallel>, #tpu.dimension_semantics<arbitrary>], iteration_bounds = array<i64: 2, 1>, scalar_prefetch = 0 : i64, scratch_operands = 1 : i64, tpu.core_type = #tpu.core_type<tc>, window_params = [{transform_indices = @transform_0, window_bounds = array<i64: 8, 128>}, {transform_indices = @transform_1, window_bounds = array<i64: 128, 128>}, {pipeline_mode = #tpu.pipeline_mode<synchronous>, transform_indices = @transform_2, window_bounds = array<i64: 1, 128>}, {transform_indices = @transform_3, window_bounds = array<i64: 8, 128>}, {pipeline_mode = #tpu.pipeline_mode<synchronous>, transform_indices = @transform_4, window_bounds = array<i64: 1, 128>}, {pipeline_mode = #tpu.pipeline_mode<synchronous>, transform_indices = @transform_5, window_bounds = array<i64: 1, 128>}, {transform_indices = @transform_6, window_bounds = array<i64: 8, 128>}]} {
    %c0_i32 = arith.constant 0 : i32
    %0 = arith.cmpi eq, %arg1, %c0_i32 : i32
    %1 = arith.extui %0 : i1 to i32
    %c0_i32_0 = arith.constant 0 : i32
    %2 = arith.cmpi ne, %1, %c0_i32_0 : i32
    scf.if %2 {
      %cst_10 = arith.constant 0.000000e+00 : f32
      %13 = vector.broadcast %cst_10 : f32 to vector<8x128xf32>
      %c0_11 = arith.constant 0 : index
      %c0_12 = arith.constant 0 : index
      %14 = vector.load %arg9[%c0_11, %c0_12] : memref<8x128xf32, #tpu.memory_space<vmem>>, vector<8x128xf32>
      tpu.vector_store %arg9[%c0_11, %c0_12], %13 {strides = array<i32>} : memref<8x128xf32, #tpu.memory_space<vmem>>, vector<8x128xf32>,
    } else {
    }
    %c0 = arith.constant 0 : index
    %c0_1 = arith.constant 0 : index
    %3 = vector.load %arg9[%c0, %c0_1] : memref<8x128xf32, #tpu.memory_space<vmem>>, vector<8x128xf32>
    %c0_2 = arith.constant 0 : index
    %c0_3 = arith.constant 0 : index
    %4 = vector.load %arg2[%c0_2, %c0_3] : memref<8x128xf32, #tpu.memory_space<vmem>>, vector<8x128xf32>
    %5 = arith.truncf %4 : vector<8x128xf32> to vector<8x128xbf16>
    %c0_4 = arith.constant 0 : index
    %c0_5 = arith.constant 0 : index
    %6 = vector.load %arg3[%c0_4, %c0_5] : memref<128x128xbf16, #tpu.memory_space<vmem>>, vector<128x128xbf16>
    %cst = arith.constant dense<0.000000e+00> : vector<8x128xf32>
    %7 = tpu.matmul %5, %6, %cst {dimension_numbers = #tpu.dot_dimension_numbers<[1], [1], [0], [0], [0, 0, 1, 0], [], []>} : vector<8x128xbf16>, vector<128x128xbf16>, vector<8x128xf32> -> vector<8x128xf32>
    %8 = arith.addf %3, %7 : vector<8x128xf32>
    %c0_6 = arith.constant 0 : index
    %c0_7 = arith.constant 0 : index
    %9 = vector.load %arg9[%c0_6, %c0_7] : memref<8x128xf32, #tpu.memory_space<vmem>>, vector<8x128xf32>
    tpu.vector_store %arg9[%c0_6, %c0_7], %8 {strides = array<i32>} : memref<8x128xf32, #tpu.memory_space<vmem>>, vector<8x128xf32>,
    %c0_i32_8 = arith.constant 0 : i32
    %10 = arith.cmpi eq, %arg1, %c0_i32_8 : i32
    %11 = arith.extui %10 : i1 to i32
    %c0_i32_9 = arith.constant 0 : i32
    %12 = arith.cmpi ne, %11, %c0_i32_9 : i32
    scf.if %12 {
      %c0_10 = arith.constant 0 : index
      %c0_11 = arith.constant 0 : index
      %13 = vector.load %arg9[%c0_10, %c0_11] : memref<8x128xf32, #tpu.memory_space<vmem>>, vector<8x128xf32>
      %c0_12 = arith.constant 0 : index
      %c0_13 = arith.constant 0 : index
      %14 = vector.load %arg4[%c0_12, %c0_13] : memref<1x128xf32, #tpu.memory_space<vmem>>, vector<1x128xf32>
      %15 = vector.broadcast %14 : vector<1x128xf32> to vector<8x128xf32>
      %16 = arith.addf %13, %15 : vector<8x128xf32>
      %c0_14 = arith.constant 0 : index
      %c0_15 = arith.constant 0 : index
      %17 = vector.load %arg5[%c0_14, %c0_15] : memref<8x128xf32, #tpu.memory_space<vmem>>, vector<8x128xf32>
      %18 = arith.addf %16, %17 : vector<8x128xf32>
      %cst_16 = arith.constant dense<0.000000e+00> : vector<8xf32>
      %19 = vector.multi_reduction <add>, %18, %cst_16 [1] : vector<8x128xf32> to vector<8xf32>
      %20 = vector.shape_cast %19 : vector<8xf32> to vector<8x1xf32>
      %cst_17 = arith.constant 7.812500e-03 : f32
      %21 = vector.broadcast %cst_17 : f32 to vector<8x1xf32>
      %22 = arith.mulf %20, %21 : vector<8x1xf32>
      %23 = vector.broadcast %22 : vector<8x1xf32> to vector<8x128xf32>
      %24 = arith.subf %18, %23 : vector<8x128xf32>
      %25 = arith.mulf %24, %24 : vector<8x128xf32>
      %cst_18 = arith.constant dense<0.000000e+00> : vector<8xf32>
      %26 = vector.multi_reduction <add>, %25, %cst_18 [1] : vector<8x128xf32> to vector<8xf32>
      %27 = vector.shape_cast %26 : vector<8xf32> to vector<8x1xf32>
      %cst_19 = arith.constant 7.812500e-03 : f32
      %28 = vector.broadcast %cst_19 : f32 to vector<8x1xf32>
      %29 = arith.mulf %27, %28 : vector<8x1xf32>
      %cst_20 = arith.constant 9.99999997E-7 : f32
      %30 = vector.broadcast %cst_20 : f32 to vector<8x1xf32>
      %31 = arith.addf %29, %30 : vector<8x1xf32>
      %32 = math.rsqrt %31 : vector<8x1xf32>
      %33 = vector.broadcast %32 : vector<8x1xf32> to vector<8x128xf32>
      %34 = arith.mulf %24, %33 : vector<8x128xf32>
      %c0_21 = arith.constant 0 : index
      %c0_22 = arith.constant 0 : index
      %35 = vector.load %arg6[%c0_21, %c0_22] : memref<1x128xf32, #tpu.memory_space<vmem>>, vector<1x128xf32>
      %36 = vector.broadcast %35 : vector<1x128xf32> to vector<8x128xf32>
      %37 = arith.mulf %34, %36 : vector<8x128xf32>
      %c0_23 = arith.constant 0 : index
      %c0_24 = arith.constant 0 : index
      %38 = vector.load %arg7[%c0_23, %c0_24] : memref<1x128xf32, #tpu.memory_space<vmem>>, vector<1x128xf32>
      %39 = vector.broadcast %38 : vector<1x128xf32> to vector<8x128xf32>
      %40 = arith.addf %37, %39 : vector<8x128xf32>
      %c0_25 = arith.constant 0 : index
      %c0_26 = arith.constant 0 : index
      %41 = vector.load %arg8[%c0_25, %c0_26] : memref<8x128xf32, #tpu.memory_space<vmem>>, vector<8x128xf32>
      tpu.vector_store %arg8[%c0_25, %c0_26], %40 {strides = array<i32>} : memref<8x128xf32, #tpu.memory_space<vmem>>, vector<8x128xf32>,
    } else {
    }
    return
  }
  func.func @transform_0(%arg0: i32, %arg1: i32) -> (i32, i32) {
    %c0_i32 = arith.constant 0 : i32
    return %arg0, %arg1 : i32, i32
  }
  func.func @transform_1(%arg0: i32, %arg1: i32) -> (i32, i32) {
    %c0_i32 = arith.constant 0 : i32
    %c0_i32_0 = arith.constant 0 : i32
    return %c0_i32, %arg1 : i32, i32
  }
  func.func @transform_2(%arg0: i32, %arg1: i32) -> (i32, i32) {
    %c0_i32 = arith.constant 0 : i32
    %c0_i32_0 = arith.constant 0 : i32
    %c0_i32_1 = arith.constant 0 : i32
    return %c0_i32, %c0_i32_0 : i32, i32
  }
  func.func @transform_3(%arg0: i32, %arg1: i32) -> (i32, i32) {
    %c0_i32 = arith.constant 0 : i32
    %c0_i32_0 = arith.constant 0 : i32
    return %arg0, %c0_i32 : i32, i32
  }
  func.func @transform_4(%arg0: i32, %arg1: i32) -> (i32, i32) {
    %c0_i32 = arith.constant 0 : i32
    %c0_i32_0 = arith.constant 0 : i32
    %c0_i32_1 = arith.constant 0 : i32
    return %c0_i32, %c0_i32_0 : i32, i32
  }
  func.func @transform_5(%arg0: i32, %arg1: i32) -> (i32, i32) {
    %c0_i32 = arith.constant 0 : i32
    %c0_i32_0 = arith.constant 0 : i32
    %c0_i32_1 = arith.constant 0 : i32
    return %c0_i32, %c0_i32_0 : i32, i32
  }
  func.func @transform_6(%arg0: i32, %arg1: i32) -> (i32, i32) {
    %c0_i32 = arith.constant 0 : i32
    %c0_i32_0 = arith.constant 0 : i32
    return %arg0, %c0_i32 : i32, i32
  }
}

</mosaic_0001>

<bundles_post_ra>
// kernel: tpu_custom_call.1
= control target key start
LH: loop header
LB: loop body
LE: loop exit
PB: predicated region body
PF: predicated region fallthrough
CT: control target
= control target key end

     0   :  { %s1199_s0 = inlined_call_operand.hbm [shape: f32[16,128], index: 0, kind: input, shape index: {}]   ;;  %s1200_s1 = inlined_call_operand.hbm [shape: bf16[128,128], index: 1, kind: input, shape index: {}]   ;;  %s1201_s2 = inlined_call_operand.vmem [shape: f32[1,128], index: 2, kind: input, shape index: {}]   ;;  %s1202_s3 = inlined_call_operand.hbm [shape: f32[16,128], index: 3, kind: input, shape index: {}]   ;;  %s1203_s4 = inlined_call_operand.vmem [shape: f32[1,128], index: 4, kind: input, shape index: {}]   ;;  %s1204_s5 = inlined_call_operand.vmem [shape: f32[1,128], index: 5, kind: input, shape index: {}]   ;;  %s1205_s6 = inlined_call_operand.hbm [shape: f32[16,128], index: 6, kind: output, shape index: {}]  }
   0x1   :  { %1210 = sst [smem:[#allocation15_spill]] %s1199_s0 }
   0x2   :  { %11 = vsyncpa [#allocation4], 0 }
   0x3   :  { %13 = vsyncpa [#allocation4 + $0x1], 0 }
   0x4   :  { %14 = vsyncpa [#allocation7], 0 }
   0x5   :  { %15 = vsyncpa [#allocation5], 0 }
   0x6   :  { %17 = vsyncpa [#allocation5 + $0x1], 0  ;;  %s985_s21 = smov 0   ;;  %s987_s22 = smov 0  }
   0x7   :  { %s989_s23 = smov 0   ;;  %s991_s24 = smov 0  }
   0x8   :  { %s993_s25 = smov 0   ;;  %s995_s26 = smov 0  }
   0x9 LB: > { %s35_s27 = sadd.s32 1, %s936_s25  ;;  %s44_s28 = sadd.s32 1, %s928_s23  ;;  %s940_s26 = sphi %s995_s26, %s23_s26   ;;  %s936_s25 = sphi %s993_s25, %s1230_s25   ;;  %s932_s24 = sphi %s991_s24, %s1229_s24   ;;  %s928_s23 = sphi %s989_s23, %s1228_s23   ;;  %s924_s22 = sphi %s987_s22, %s1227_s22   ;;  %s920_s21 = sphi %s985_s21, %s1226_s21  }
   0xa   : > { %p37_p0 = scmp.ge.s32.totalorder %s35_s27, 2  ;;  %p51_p1 = scmp.ne.s32.totalorder %s928_s23, %s924_s22 }
   0xb   : > { %p52_p2 = scmp.eq.s32.totalorder %s940_s26, 0  ;;  %p704_p5 = scmp.lt.s32.totalorder %s940_s26, 2 }
   0xc   : > { %s1232_s27 = smov (%p37_p0, %s35_s27), 0  ;;  %s246_s30 = sand.u32 1, %s940_s26  }
   0xd   : > { %1211 = sst [smem:[#allocation14_spill]] %s1232_s27  ;;  %p53_p4 = por %p52_p2, %p51_p1 }
   0xe   : > { %s39_s29 = ssub.s32 %s936_s25, %s1232_s27  ;;  %s248_s7 = sand.u32 1, %s928_s23  }
   0xf   : > { %p42_p6 = scmp.eq.s32.totalorder %s39_s29, 0  ;;  %s626_s8 = sshll.u32 %s936_s25, 7 }
  0x10   : > { %s1035_s10 = sshll.u32 %s248_s7, 3  ;;  %s1212_s0 = sld [smem:[#allocation15_spill]] }
  0x11   : > { %s1033_s9 = scalar_select %p42_p6, %s928_s23, %s44_s28  }
  0x12   : > { %p1042_p7 = pnand %p704_p5, %p53_p4  ;;  %s250_s15 = scalar_lea.vmem [#allocation3], %s1035_s10 }
  0x13   : > { %s258_s16 = sshll.u32 %s250_s15, 4  ;;  %s1047_s17 = scalar_lea.sflag [#allocation4], %s246_s30  ;;  %s259_s16 = int_to_ptr.vmem [resolvable:$true] %s258_s16 }
  0x14   : > { %p772_p8 = pneg %p1042_p7  ;;  %s783_s18 = scalar_lea.vmem %s259_s16, 128 }
  0x15   : > { %p784_p9 = scmp.ne.s32.totalorder %s259_s16, %s783_s18  ;;  %s942_s19 = smov [#allocation3]  }
  0x16   : > { %s256_s13 = scalar_lea.hbm %s1212_s0, %s626_s8  ;;  %s788_s20 = sshll.u32 %s942_s19, 4  ;;  %s789_s20 = int_to_ptr.vmem [resolvable:$false] %s788_s20 }
  0x17   : > { %p786_p10 = pnand %p784_p9, %p772_p8  ;;  %s790_s28 = scalar_lea.vmem %s789_s20, 256 }
  0x18   : > { %p791_p12 = scmp.lt.s32.totalorder %s259_s16, %s789_s20  ;;  %p792_p13 = scmp.lt.s32.totalorder %s790_s28, %s783_s18 }
  0x19   : > { %p787_p11 = pneg %p786_p10 }
  0x1a   : > { %p793_p0 = por %p792_p13, %p791_p12 }
  0x1c   : > { %p794_p2 = pnand %p793_p0, %p787_p11 }
  0x1e   : > { %797 = shalt.err (!%p794_p2)
}
  0x1f   : > { %695 = dma.hbm_to_vmem [thread:$0]  (!%p1042_p7), %s256_s13, 128, %s259_s16, %s1047_s17  }
  0x20   : > { %s1058_s29 = sadd.s32 4294967295, %s940_s26   ;;  %s621_s30 = sadd.s32 4294967294, %s940_s26  }
  0x21   : > { %p57_p4 = scmp.ne.s32.totalorder %s924_s22, %s920_s21  ;;  %p1208_p5 = scmp.eq.s32.totalorder %s1058_s29, 0 }
  0x22   : > { %p196_p6 = scmp.eq.s32.totalorder %s1058_s29, 1  ;;  %p202_p9 = scmp.eq.s32.totalorder %s621_s30, 1 }
  0x23   : > { %p622_p10 = scmp.ge.s32.totalorder %s940_s26, 1  ;;  %p1068_p11 = por %p1208_p5, %p57_p4 }
  0x24   : > { %p1075_p12 = por %p196_p6, %p51_p1  ;;  %p1079_p13 = por %p202_p9, %p57_p4 }
  0x25   : > { %s1214_s7 = scalar_select %p1068_p11, 1, 0 }
  0x26   : > { %s1215_s11 = scalar_select %p1075_p12, 1, 0 }
  0x27   : > { %s1216_s12 = scalar_select %p1079_p13, 1, 0 }
  0x28   : > { %p209_p0 = scmp.lt.s32.totalorder %s940_s26, 3  ;;  %s943_s15 = smov [#allocation6]  }
  0x29   : > { %s223_s16 = sshll.u32 %s943_s15, 4  ;;  %s274_s20 = scalar_lea.hbm %s1202_s3, %s626_s8  ;;  %s1093_s16 = int_to_ptr.vmem [resolvable:$true] %s223_s16 }
  0x2a   : > { %p1084_p2 = pnand %p622_p10, %p209_p0  ;;  %s269_s28 = scalar_lea.vmem [#allocation8], %s1035_s10 }
  0x2b   : > { %s276_s30 = sshll.u32 %s269_s28, 4  ;;  %s944_s15 = smov [#allocation8]   ;;  %s277_s30 = int_to_ptr.vmem [resolvable:$true] %s276_s30 }
  0x2c   : > { %p688_p1 = pneg %p1084_p2  ;;  %s811_s27 = scalar_lea.vmem %s277_s30, 128 }
  0x2d   : > { %p812_p6 = scmp.ne.s32.totalorder %s277_s30, %s811_s27  ;;  %s816_s8 = sshll.u32 %s944_s15, 4  ;;  %s817_s8 = int_to_ptr.vmem [resolvable:$false] %s816_s8 }
  0x2e   : > { %p1100_p4 = pnand %p688_p1, %p1208_p5  ;;  %s818_s18 = scalar_lea.vmem %s817_s8, 256 }
  0x2f   : > { %p814_p9 = pnand %p812_p6, %p772_p8  ;;  %p819_p0 = scmp.lt.s32.totalorder %s277_s30, %s817_s8 }
  0x30   : > { %p820_p3 = scmp.lt.s32.totalorder %s818_s18, %s811_s27 }
  0x31   : > { %p815_p10 = pneg %p814_p9 }
  0x32   : > { %p821_p13 = por %p820_p3, %p819_p0 }
  0x34   : > { %p822_p12 = pnand %p821_p13, %p815_p10 }
  0x36   : > { %825 = shalt.err (!%p822_p12)
}
  0x37   : > { %698 = dma.hbm_to_vmem [thread:$0]  (!%p1042_p7), %s274_s20, 128, %s277_s30, %s1047_s17  }
  0x38   : > { %p828_p8 = pneg %p1100_p4  ;;  %s837_s10 = scalar_lea.vmem %s1093_s16, 1024 }
  0x39   : > { %p838_p1 = scmp.ne.s32.totalorder %s1093_s16, %s837_s10  ;;  %p845_p5 = scmp.lt.s32.totalorder %s1093_s16, %s1093_s16 }
  0x3a   : > { %p846_p11 = scmp.lt.s32.totalorder %s837_s10, %s837_s10 }
  0x3b   : > { %p840_p6 = pnand %p838_p1, %p828_p8 }
  0x3c   : > { %p847_p3 = por %p846_p11, %p845_p5 }
  0x3d   : > { %p841_p9 = pneg %p840_p6 }
  0x3f   : > { %p848_p13 = pnand %p847_p3, %p841_p9 }
  0x41   : > { %851 = shalt.err (!%p848_p13)
}
  0x42   : > { %s945_s27 = smov 64   ;;  %s946_s14 = smov 4  }
  0x43   : > { %691 = dma.hbm_to_vmem [thread:$0]  (!%p1100_p4), %s1200_s1, 1024, %s1093_s16, [#allocation7], %s945_s27, %s945_s27, %s946_s14  }
  0x44   : > { %285 = sbr.rel (%p1084_p2) target bundleno = 661 (0x295), region = 44  ;;  %s287_s17 = sand.u32 (!%p1084_p2), 1, %s1058_s29  }
  0x45   : > { %s289_s20 = sand.u32 (!%p1084_p2), 1, %s924_s22   ;;  %s288_s15 = scalar_lea.sflag (!%p1084_p2), [#allocation4], %s287_s17 }
  0x46   : > { %s1128_s30 = sshll.u32 (!%p1084_p2), %s289_s20, 3  ;;  %p1219_p7 = scmp.ne.s32.totalorder (!%p1084_p2), %s1214_s7, 0 }
  0x47   : > { %s291_s8 = scalar_lea.vmem (!%p1084_p2), [#allocation3], %s1128_s30 }
  0x49   : > { %903 = dma.done.wait (%p1219_p7), %s288_s15, 128  }
  0x4a   : > { %905 = vsyncadd (%p1219_p7), %s288_s15, 4294967168  ;;  %p1220_p5 = scmp.eq.s32.totalorder %s1058_s29, 0 }
  0x4c   : > { %907 = dma.done.wait (%p1220_p5), [#allocation7], 1024   ;;  %p1221_p11 = pmov %p1220_p5 }
  0x4d   : > { %s304_s0 = scalar_lea.vmem [#allocation8], %s1128_s30 }
  0x4e   : > { %909 = vsyncadd (%p1221_p11), [#allocation7], 4294966272 }
  0x4f   : > { %911 = dma.done.wait (%p1219_p7), %s288_s15, 128  }
  0x50   : > { %913 = vsyncadd (%p1219_p7), %s288_s15, 4294967168  ;;  %v947_v0 = vmov 0.0   ;;  %vm948_vm0 = vmmov 0   ;;  %v760_v1 = vld [vmem:[#allocation6 + $0x38] sm:$0xff]   ;;  %v761_v2 = vld [vmem:[#allocation6 + $0x30] sm:$0xff]   ;;  %s646_s27 = sshll.u32 %s932_s24, 7 }
  0x51   : > { %658 = vmatprep.subr.bf16.mxu0 %v947_v0  ;;  %674 = vmatprep.mubr.msk.bf16.mxu0 %vm948_vm0, %v947_v0  ;;  %v762_v3 = vld [vmem:[#allocation6 + $0x28] sm:$0xff]   ;;  %v763_v4 = vld [vmem:[#allocation6 + $0x20] sm:$0xff]   ;;  %v764_v5 = vld [vmem:[#allocation6 + $0x18] sm:$0xff]   ;;  %s337_s14 = scalar_lea.vmem [#allocation9], %s1128_s30  ;;  %s507_s15 = scalar_lea.hbm %s1205_s6, %s646_s27 }
  0x52   : > { %659 = vmatpush3.bf16.xpose.msra.mxu0 %v760_v1  ;;  %v765_v6 = vld [vmem:[#allocation6 + $0x10] sm:$0xff]   ;;  %v766_v7 = vld [vmem:[#allocation6 + $0x8] sm:$0xff]   ;;  %v767_v8 = vld [vmem:[#allocation6] sm:$0xff]   ;;  %s509_s19 = sshll.u32 %s337_s14, 4  ;;  %p1222_p2 = scmp.ne.s32.totalorder %s1215_s11, 0  ;;  %s510_s19 = int_to_ptr.vmem [resolvable:$true] %s509_s19 }
  0x53   : > { %660 = vmatprep.subr.bf16.mxu0 %v947_v0  ;;  %v345_v9 = vld [vmem:[%s291_s8] sm:$0xff]  ;;  %v465_v13 = vld [vmem:[%s304_s0] sm:$0xff]  ;;  %s496_s8 = scalar_lea.sflag [#allocation5], %s289_s20  ;;  %s852_s0 = scalar_lea.vmem %s510_s19, 128 }
  0x54   : > { %v346_v10 = vpack.c.bf16 %v345_v9, %v345_v9  ;;  %v642_v11 = vld [vmem:[%s1201_s2] ss:$0 sm:$0xff]  ;;  %p853_p12 = scmp.ne.s32.totalorder %s510_s19, %s852_s0  ;;  %s949_s29 = smov [#allocation9]  }
  0x55   : > { %v643_v27 = vld [vmem:[%s1203_s4] ss:$0 sm:$0xff]  ;;  %s856_s7 = sshll.u32 %s949_s29, 4  ;;  %s857_s7 = int_to_ptr.vmem [resolvable:$false] %s856_s7 }
  0x56   : > { %v644_v29 = vld [vmem:[%s1204_s5] ss:$0 sm:$0xff]  ;;  %p854_p4 = pnand %p853_p12, %p1222_p2  ;;  %s858_s24 = scalar_lea.vmem %s857_s7, 256 }
  0x57   : > { %p859_p0 = scmp.lt.s32.totalorder %s510_s19, %s857_s7  ;;  %p860_p8 = scmp.lt.s32.totalorder %s858_s24, %s852_s0 }
  0x58   : > { %p855_p10 = pneg %p854_p4 }
  0x59   : > { %p861_p1 = por %p860_p8, %p859_p0 }
  0x5a   : > { %661 = vmatpush3.bf16.xpose.msra.mxu0 %v761_v2 }
  0x5b   : > { %662 = vmatprep.subr.bf16.mxu0 %v947_v0  ;;  %p862_p6 = pnand %p861_p1, %p855_p10 }
  0x62   : > { %663 = vmatpush3.bf16.xpose.msra.mxu0 %v762_v3 }
  0x63   : > { %664 = vmatprep.subr.bf16.mxu0 %v947_v0 }
  0x6a   : > { %665 = vmatpush3.bf16.xpose.msra.mxu0 %v763_v4 }
  0x6b   : > { %666 = vmatprep.subr.bf16.mxu0 %v947_v0 }
  0x72   : > { %667 = vmatpush3.bf16.xpose.msra.mxu0 %v764_v5 }
  0x73   : > { %668 = vmatprep.subr.bf16.mxu0 %v947_v0 }
  0x7a   : > { %669 = vmatpush3.bf16.xpose.msra.mxu0 %v765_v6 }
  0x7b   : > { %670 = vmatprep.subr.bf16.mxu0 %v947_v0 }
  0x82   : > { %671 = vmatpush3.bf16.xpose.msra.mxu0 %v766_v7 }
  0x83   : > { %672 = vmatprep.subr.bf16.mxu0 %v947_v0 }
  0x8a   : > { %673 = vmatpush3.bf16.xpose.msra.mxu0 %v767_v8 }
  0x91   : > { %675 = vmatmul.mubr.bf16.vlgmr.msra.gmra.mxu0 %v346_v10 }
 0x151   : > { %v445_v12 = vpop.f32.mrf.mxu0 }
 0x152   : > { %v464_v14 = vadd.f32 %v642_v11, %v445_v12 }
 0x153   : > { %v676_v15 = vpop.f32.mrf.mxu0 }
 0x154   : > { %v466_v16 = vadd.f32 %v465_v13, %v464_v14 }
 0x155   : > { %v448_v17 = vpop.f32.mrf.mxu0 }
 0x156   : > { %467 = vadd.xlane.f32.xlu0 %v466_v16 }
 0x157   : > { %v677_v18 = vpop.f32.mrf.mxu0 }
 0x1df   : > { %v468_v19 = vpop.xlane.xlu0 %467 }
 0x1e0   : > { %v469_v20 = vmul.f32 0.0078125, %v468_v19 }
 0x1e2   : > { %v470_v21 = vsub.f32 %v466_v16, %v469_v20 }
 0x1e4   : > { %v471_v22 = vmul.f32 %v470_v21, %v470_v21 }
 0x1e6   : > { %472 = vadd.xlane.f32.xlu0 %v471_v22 }
 0x26f   : > { %v473_v23 = vpop.xlane.xlu0 %472 }
 0x270   : > { %v474_v24 = vmul.f32 0.0078125, %v473_v23 }
 0x272   : > { %v475_v25 = vadd.f32 1e-06, %v474_v24 }
 0x274   : > { %768 = vrsqrt.f32 %v475_v25 }
 0x281   : > { %v769_v26 = vpop.eup %768 }
 0x282   : > { %v477_v28 = vmul.f32 %v769_v26, %v470_v21 }
 0x284   : > { %v485_v30 = vmul.f32 %v643_v27, %v477_v28 }
 0x286   : > { %v493_v31 = vadd.f32 %v644_v29, %v485_v30 }
 0x288   : > { %494 = vst [vmem:[%s337_s14] sm:$0xff] %v493_v31 }
 0x289   : > { %865 = shalt.err (!%p862_p6)
}
 0x28a   : > { %s866_s30 = scalar_lea.hbm %s507_s15, 128  ;;  %s870_s16 = scalar_lea.hbm %s1205_s6, 256 }
 0x28b   : > { %p867_p9 = scmp.ne.s32.totalorder %s507_s15, %s866_s30  ;;  %p871_p7 = scmp.lt.s32.totalorder %s507_s15, %s1205_s6 }
 0x28c   : > { %p872_p5 = scmp.lt.s32.totalorder %s870_s16, %s866_s30 }
 0x28d   : > { %p868_p3 = pnand %p867_p9, %p1222_p2 }
 0x28e   : > { %p873_p11 = por %p872_p5, %p871_p7 }
 0x28f   : > { %p869_p13 = pneg %p868_p3 }
 0x291   : > { %p874_p12 = pnand %p873_p11, %p869_p13 }
 0x293   : > { %877 = shalt.err (!%p874_p12)
}
 0x294   : > { %686 = dma.vmem_to_hbm [thread:$0]  (%p1222_p2), %s510_s19, 128, %s507_s15, %s496_s8  }
 0x295 PF: > { %s521_s27 = sand.u32 1, %s920_s21   ;;  %p1223_p4 = scmp.ne.s32.totalorder %s1216_s12, 0 }
 0x296   : > { %p1224_p10 = scmp.ge.s32.totalorder %s940_s26, 2  ;;  %s522_s14 = scalar_lea.sflag [#allocation5], %s521_s27 }
 0x298   : > { %p700_p0 = pnand %p1224_p10, %p1223_p4 }
 0x29a   : > { %p701_p8 = pneg %p700_p0 }
 0x29c   : > { %915 = dma.done.wait (%p701_p8), %s522_s14, 128  }
 0x29d   : > { %917 = vsyncadd (%p701_p8), %s522_s14, 4294967168  ;;  %s23_s26 = sadd.s32 1, %s940_s26   ;;  %s1225_s11 = sld [smem:[#allocation14_spill]] }
 0x29e   : > { %p20_p1 = scmp.ge.s32.totalorder %s23_s26, 4   ;;  %s1226_s21 = smov %s924_s22 }
 0x29f   : > { %s1227_s22 = smov %s928_s23  ;;  %s1228_s23 = smov %s1033_s9 }
 0x2a0   : > { %s1229_s24 = smov %s936_s25  ;;  %22 = sbr.rel (!%p20_p1) target bundleno = 9 (0x9), region = 113 }
 0x2a3   : > { %s1230_s25 = smov %s1225_s11 }
 0x2a5   :  { %527 = vsyncpa [#allocation4], 1 }
 0x2a6   :  { %529 = vsyncpa [#allocation4 + $0x1], 1 }
 0x2a7   :  { %530 = vsyncpa [#allocation7], 1 }
 0x2a8   :  { %531 = vsyncpa [#allocation5], 1 }
 0x2a9   :  { %533 = vsyncpa [#allocation5 + $0x1], 1 }

</bundles_post_ra>
